<compile_context>
chip_gen: v7x
topology: tpu7x:2x2x1
jax: 0.10.0
libtpu: 0.0.40
codegen_flags: <defaults>
</compile_context>

<pallas_src>
import jax
import jax.numpy as jnp
from jax.experimental import pallas as pl
from jax.experimental.pallas import tpu as pltpu

LN_EPS = 1e-5
NEG_SLOPE = 0.1
_HIGHEST = jax.lax.Precision.HIGHEST


def _baseline_mlp_kernel(
    x_ref,       # (TB, D_in)
    w1_ref,      # (D_in, H)
    b1_ref,      # (1, H)
    gamma_ref,   # (1, H)
    beta_ref,    # (1, H)
    w_out_ref,   # (H, D_out)
    w_skip_ref,  # (D_in, D_out)
    bcat_ref,    # (1, D_out)  == b_out + b_skip
    o_ref,       # (TB, D_out)
):
    x = x_ref[...]

    # fc1 (MXU, f32-faithful)
    h = (
        jnp.dot(x, w1_ref[...], preferred_element_type=jnp.float32, precision=_HIGHEST)
        + b1_ref[...]
    )

    # LayerNorm over the last dim (hidden_dim), matching nn.LayerNorm defaults.
    # Single pass: mean and E[h^2] are independent cross-lane reductions.
    mean = jnp.mean(h, axis=-1, keepdims=True)
    mean_sq = jnp.mean(h * h, axis=-1, keepdims=True)
    var = jnp.maximum(mean_sq - mean * mean, 0.0)
    h = (h - mean) * jax.lax.rsqrt(var + LN_EPS)
    h = h * gamma_ref[...] + beta_ref[...]

    # LeakyReLU(negative_slope=0.1): single VPU max.
    h = jnp.maximum(h, NEG_SLOPE * h)

    # Dropout: identity in eval/inference mode.
    # TODO(synk): training-mode dropout with pltpu.prng_random_bits if a training path is needed.

    # Epilogue: two tiny dots (MXU is idle at these shapes; avoids a lane-axis concat).
    out = (
        jnp.dot(h, w_out_ref[...], preferred_element_type=jnp.float32, precision=_HIGHEST)
        + jnp.dot(x, w_skip_ref[...], preferred_element_type=jnp.float32, precision=_HIGHEST)
        + bcat_ref[...]
    )
    o_ref[...] = out.astype(o_ref.dtype)


def _round_up(n, m):
    return ((n + m - 1) // m) * m


def baseline_mlp(x, params, *, block_rows=8192):
    """x: (B, input_dim) float32. params: dict of weights in (in, out) layout."""
    B, D_in = x.shape
    H = params["w1"].shape[1]
    D_out = params["w_out"].shape[1]

    # Fold the two biases together once, outside the kernel.
    b_cat = params["b_out"] + params["b_skip"]  # (1, D_out)

    # Batch tile: multiple of 8 sublanes. No padding/slicing of x or out — the grid uses cdiv
    # and Pallas masks the partial final block (LN is per-row, so OOB garbage rows are harmless).
    tb = _round_up(min(block_rows, _round_up(B, 8)), 8)
    # v7x megacore: prefer >= 2 parallel grid steps when the batch is big enough to split.
    if pl.cdiv(B, tb) < 2 and B >= 16:
        tb = _round_up(pl.cdiv(B, 2), 8)
    nb = pl.cdiv(B, tb)

    def const_spec(shape):
        # Full-array block with a constant index_map: stays VMEM-resident across all grid steps.
        return pl.BlockSpec(shape, lambda i, _s=shape: tuple(0 for _ in _s))

    out = pl.pallas_call(
        _baseline_mlp_kernel,
        out_shape=jax.ShapeDtypeStruct((B, D_out), jnp.float32),
        grid=(nb,),
        in_specs=[
            pl.BlockSpec((tb, D_in), lambda i: (i, 0)),   # x: tiled over batch
            const_spec((D_in, H)),                        # w1
            const_spec((1, H)),                           # b1
            const_spec((1, H)),                           # gamma
            const_spec((1, H)),                           # beta
            const_spec((H, D_out)),                       # w_out
            const_spec((D_in, D_out)),                    # w_skip
            const_spec((1, D_out)),                       # b_cat
        ],
        out_specs=pl.BlockSpec((tb, D_out), lambda i: (i, 0)),
        compiler_params=pltpu.CompilerParams(
            dimension_semantics=("parallel",),            # megacore-shardable on v7x
            vmem_limit_bytes=32 * 1024 * 1024,            # plenty: <2 MiB/tile even at tb=8192
        ),
    )(
        x,
        params["w1"],
        params["b1"],
        params["gamma"],
        params["beta"],
        params["w_out"],
        params["w_skip"],
        b_cat,
    )
    return out


def init_params(key, input_dim, hidden_dim, output_dim):
    """Deterministic synthetic parameters (uniform, roughly PyTorch Linear-style scale)."""
    ks = jax.random.split(key, 6)

    def lin(kw, kb, fan_in, fan_out):
        bound = 1.0 / jnp.sqrt(fan_in)
        w = jax.random.uniform(kw, (fan_in, fan_out), jnp.float32, -bound, bound)
        b = jax.random.uniform(kb, (1, fan_out), jnp.float32, -bound, bound)
        return w, b

    w1, b1 = lin(ks[0], ks[1], input_dim, hidden_dim)
    w_out, b_out = lin(ks[2], ks[3], hidden_dim, output_dim)
    w_skip, b_skip = lin(ks[4], ks[5], input_dim, output_dim)
    return {
        "w1": w1, "b1": b1,
        "gamma": jnp.ones((1, hidden_dim), jnp.float32),
        "beta": jnp.zeros((1, hidden_dim), jnp.float32),
        "w_out": w_out, "b_out": b_out,
        "w_skip": w_skip, "b_skip": b_skip,
    }


def baseline_mlp_ref(x, p):
    """Pure-JAX reference for correctness checking (mirrors the PyTorch forward)."""
    h = x @ p["w1"] + p["b1"]
    mean = jnp.mean(h, axis=-1, keepdims=True)
    var = jnp.mean((h - mean) ** 2, axis=-1, keepdims=True)
    h = (h - mean) / jnp.sqrt(var + LN_EPS) * p["gamma"] + p["beta"]
    h = jnp.where(h > 0, h, NEG_SLOPE * h)
    return h @ p["w_out"] + p["b_out"] + x @ p["w_skip"] + p["b_skip"]


if __name__ == "__main__":
    input_dim, hidden_dim, output_dim = 21, 32, 4
    batch = 8

    key = jax.random.PRNGKey(0)
    kx, kp = jax.random.split(key)
    x = jax.random.normal(kx, (batch, input_dim), jnp.float32)
    params = init_params(kp, input_dim, hidden_dim, output_dim)

    out = baseline_mlp(x, params)
    out = jax.block_until_ready(out)

    ref = baseline_mlp_ref(x, params)
    assert out.shape == (batch, output_dim)
    assert jnp.allclose(out, ref, atol=1e-4, rtol=1e-4), "mismatch vs reference"

    print("KERNEL_OK")
</pallas_src>

<mosaic_0001>
module attributes {stable_mosaic.version = 11 : i64} {
  func.func @_baseline_mlp_kernel(%arg0: i32, %arg1: memref<8x21xf32, #tpu.memory_space<vmem>>, %arg2: memref<21x32xf32, #tpu.memory_space<vmem>>, %arg3: memref<1x32xf32, #tpu.memory_space<vmem>>, %arg4: memref<1x32xf32, #tpu.memory_space<vmem>>, %arg5: memref<1x32xf32, #tpu.memory_space<vmem>>, %arg6: memref<32x4xf32, #tpu.memory_space<vmem>>, %arg7: memref<21x4xf32, #tpu.memory_space<vmem>>, %arg8: memref<1x4xf32, #tpu.memory_space<vmem>>, %arg9: memref<8x4xf32, #tpu.memory_space<vmem>>) attributes {dimension_semantics = [#tpu.dimension_semantics<parallel>], iteration_bounds = array<i64: 1>, scalar_prefetch = 0 : i64, scratch_operands = 0 : i64, tpu.core_type = #tpu.core_type<tc>, window_params = [{transform_indices = @transform_0, window_bounds = array<i64: 8, 21>}, {pipeline_mode = #tpu.pipeline_mode<synchronous>, transform_indices = @transform_1, window_bounds = array<i64: 21, 32>}, {pipeline_mode = #tpu.pipeline_mode<synchronous>, transform_indices = @transform_2, window_bounds = array<i64: 1, 32>}, {pipeline_mode = #tpu.pipeline_mode<synchronous>, transform_indices = @transform_3, window_bounds = array<i64: 1, 32>}, {pipeline_mode = #tpu.pipeline_mode<synchronous>, transform_indices = @transform_4, window_bounds = array<i64: 1, 32>}, {pipeline_mode = #tpu.pipeline_mode<synchronous>, transform_indices = @transform_5, window_bounds = array<i64: 32, 4>}, {pipeline_mode = #tpu.pipeline_mode<synchronous>, transform_indices = @transform_6, window_bounds = array<i64: 21, 4>}, {pipeline_mode = #tpu.pipeline_mode<synchronous>, transform_indices = @transform_7, window_bounds = array<i64: 1, 4>}, {transform_indices = @transform_8, window_bounds = array<i64: 8, 4>}]} {
    %c0 = arith.constant 0 : index
    %c0_0 = arith.constant 0 : index
    %0 = vector.load %arg1[%c0, %c0_0] : memref<8x21xf32, #tpu.memory_space<vmem>>, vector<8x21xf32>
    %c0_1 = arith.constant 0 : index
    %c0_2 = arith.constant 0 : index
    %1 = vector.load %arg2[%c0_1, %c0_2] : memref<21x32xf32, #tpu.memory_space<vmem>>, vector<21x32xf32>
    %cst = arith.constant dense<0.000000e+00> : vector<8x32xf32>
    %2 = tpu.matmul %0, %1, %cst {dimension_numbers = #tpu.dot_dimension_numbers<[1], [0], [0], [1], [0, 0, 1, 1], [], []>, precision = #tpu.contract_precision<fp32>} : vector<8x21xf32>, vector<21x32xf32>, vector<8x32xf32> -> vector<8x32xf32>
    %c0_3 = arith.constant 0 : index
    %c0_4 = arith.constant 0 : index
    %3 = vector.load %arg3[%c0_3, %c0_4] : memref<1x32xf32, #tpu.memory_space<vmem>>, vector<1x32xf32>
    %4 = vector.broadcast %3 : vector<1x32xf32> to vector<8x32xf32>
    %5 = arith.addf %2, %4 : vector<8x32xf32>
    %cst_5 = arith.constant dense<0.000000e+00> : vector<8xf32>
    %6 = vector.multi_reduction <add>, %5, %cst_5 [1] : vector<8x32xf32> to vector<8xf32>
    %7 = vector.shape_cast %6 : vector<8xf32> to vector<8x1xf32>
    %cst_6 = arith.constant 3.200000e+01 : f32
    %8 = vector.broadcast %cst_6 : f32 to vector<8x1xf32>
    %9 = arith.divf %7, %8 : vector<8x1xf32>
    %10 = arith.mulf %5, %5 : vector<8x32xf32>
    %cst_7 = arith.constant dense<0.000000e+00> : vector<8xf32>
    %11 = vector.multi_reduction <add>, %10, %cst_7 [1] : vector<8x32xf32> to vector<8xf32>
    %12 = vector.shape_cast %11 : vector<8xf32> to vector<8x1xf32>
    %cst_8 = arith.constant 3.200000e+01 : f32
    %13 = vector.broadcast %cst_8 : f32 to vector<8x1xf32>
    %14 = arith.divf %12, %13 : vector<8x1xf32>
    %15 = arith.mulf %9, %9 : vector<8x1xf32>
    %16 = arith.subf %14, %15 : vector<8x1xf32>
    %cst_9 = arith.constant 0.000000e+00 : f32
    %17 = vector.broadcast %cst_9 : f32 to vector<8x1xf32>
    %18 = arith.maximumf %16, %17 : vector<8x1xf32>
    %19 = vector.broadcast %9 : vector<8x1xf32> to vector<8x32xf32>
    %20 = arith.subf %5, %19 : vector<8x32xf32>
    %cst_10 = arith.constant 9.99999974E-6 : f32
    %21 = vector.broadcast %cst_10 : f32 to vector<8x1xf32>
    %22 = arith.addf %18, %21 : vector<8x1xf32>
    %23 = math.rsqrt %22 : vector<8x1xf32>
    %24 = vector.broadcast %23 : vector<8x1xf32> to vector<8x32xf32>
    %25 = arith.mulf %20, %24 : vector<8x32xf32>
    %c0_11 = arith.constant 0 : index
    %c0_12 = arith.constant 0 : index
    %26 = vector.load %arg4[%c0_11, %c0_12] : memref<1x32xf32, #tpu.memory_space<vmem>>, vector<1x32xf32>
    %27 = vector.broadcast %26 : vector<1x32xf32> to vector<8x32xf32>
    %28 = arith.mulf %25, %27 : vector<8x32xf32>
    %c0_13 = arith.constant 0 : index
    %c0_14 = arith.constant 0 : index
    %29 = vector.load %arg5[%c0_13, %c0_14] : memref<1x32xf32, #tpu.memory_space<vmem>>, vector<1x32xf32>
    %30 = vector.broadcast %29 : vector<1x32xf32> to vector<8x32xf32>
    %31 = arith.addf %28, %30 : vector<8x32xf32>
    %cst_15 = arith.constant 1.000000e-01 : f32
    %32 = vector.broadcast %cst_15 : f32 to vector<8x32xf32>
    %33 = arith.mulf %32, %31 : vector<8x32xf32>
    %34 = arith.maximumf %31, %33 : vector<8x32xf32>
    %c0_16 = arith.constant 0 : index
    %c0_17 = arith.constant 0 : index
    %35 = vector.load %arg6[%c0_16, %c0_17] : memref<32x4xf32, #tpu.memory_space<vmem>>, vector<32x4xf32>
    %cst_18 = arith.constant dense<0.000000e+00> : vector<8x4xf32>
    %36 = tpu.matmul %34, %35, %cst_18 {dimension_numbers = #tpu.dot_dimension_numbers<[1], [0], [0], [1], [0, 0, 1, 1], [], []>, precision = #tpu.contract_precision<fp32>} : vector<8x32xf32>, vector<32x4xf32>, vector<8x4xf32> -> vector<8x4xf32>
    %c0_19 = arith.constant 0 : index
    %c0_20 = arith.constant 0 : index
    %37 = vector.load %arg7[%c0_19, %c0_20] : memref<21x4xf32, #tpu.memory_space<vmem>>, vector<21x4xf32>
    %cst_21 = arith.constant dense<0.000000e+00> : vector<8x4xf32>
    %38 = tpu.matmul %0, %37, %cst_21 {dimension_numbers = #tpu.dot_dimension_numbers<[1], [0], [0], [1], [0, 0, 1, 1], [], []>, precision = #tpu.contract_precision<fp32>} : vector<8x21xf32>, vector<21x4xf32>, vector<8x4xf32> -> vector<8x4xf32>
    %39 = arith.addf %36, %38 : vector<8x4xf32>
    %c0_22 = arith.constant 0 : index
    %c0_23 = arith.constant 0 : index
    %40 = vector.load %arg8[%c0_22, %c0_23] : memref<1x4xf32, #tpu.memory_space<vmem>>, vector<1x4xf32>
    %41 = vector.broadcast %40 : vector<1x4xf32> to vector<8x4xf32>
    %42 = arith.addf %39, %41 : vector<8x4xf32>
    %c0_24 = arith.constant 0 : index
    %c0_25 = arith.constant 0 : index
    %43 = vector.load %arg9[%c0_24, %c0_25] : memref<8x4xf32, #tpu.memory_space<vmem>>, vector<8x4xf32>
    tpu.vector_store %arg9[%c0_24, %c0_25], %42 {strides = array<i32>} : memref<8x4xf32, #tpu.memory_space<vmem>>, vector<8x4xf32>,
    return
  }
  func.func @transform_0(%arg0: i32) -> (i32, i32) {
    %c0_i32 = arith.constant 0 : i32
    %c0_i32_0 = arith.constant 0 : i32
    return %arg0, %c0_i32 : i32, i32
  }
  func.func @transform_1(%arg0: i32) -> (i32, i32) {
    %c0_i32 = arith.constant 0 : i32
    %c0_i32_0 = arith.constant 0 : i32
    %c0_i32_1 = arith.constant 0 : i32
    return %c0_i32, %c0_i32_0 : i32, i32
  }
  func.func @transform_2(%arg0: i32) -> (i32, i32) {
    %c0_i32 = arith.constant 0 : i32
    %c0_i32_0 = arith.constant 0 : i32
    %c0_i32_1 = arith.constant 0 : i32
    return %c0_i32, %c0_i32_0 : i32, i32
  }
  func.func @transform_3(%arg0: i32) -> (i32, i32) {
    %c0_i32 = arith.constant 0 : i32
    %c0_i32_0 = arith.constant 0 : i32
    %c0_i32_1 = arith.constant 0 : i32
    return %c0_i32, %c0_i32_0 : i32, i32
  }
  func.func @transform_4(%arg0: i32) -> (i32, i32) {
    %c0_i32 = arith.constant 0 : i32
    %c0_i32_0 = arith.constant 0 : i32
    %c0_i32_1 = arith.constant 0 : i32
    return %c0_i32, %c0_i32_0 : i32, i32
  }
  func.func @transform_5(%arg0: i32) -> (i32, i32) {
    %c0_i32 = arith.constant 0 : i32
    %c0_i32_0 = arith.constant 0 : i32
    %c0_i32_1 = arith.constant 0 : i32
    return %c0_i32, %c0_i32_0 : i32, i32
  }
  func.func @transform_6(%arg0: i32) -> (i32, i32) {
    %c0_i32 = arith.constant 0 : i32
    %c0_i32_0 = arith.constant 0 : i32
    %c0_i32_1 = arith.constant 0 : i32
    return %c0_i32, %c0_i32_0 : i32, i32
  }
  func.func @transform_7(%arg0: i32) -> (i32, i32) {
    %c0_i32 = arith.constant 0 : i32
    %c0_i32_0 = arith.constant 0 : i32
    %c0_i32_1 = arith.constant 0 : i32
    return %c0_i32, %c0_i32_0 : i32, i32
  }
  func.func @transform_8(%arg0: i32) -> (i32, i32) {
    %c0_i32 = arith.constant 0 : i32
    %c0_i32_0 = arith.constant 0 : i32
    return %arg0, %c0_i32 : i32, i32
  }
}

</mosaic_0001>

<bundles_post_ra>
// kernel: tpu_custom_call.1
= control target key start
LH: loop header
LB: loop body
LE: loop exit
PB: predicated region body
PF: predicated region fallthrough
CT: control target
= control target key end

     0   :  { %vm44_vm0 = vcmask 1044480   ;;  %v1884_v0 = vmov 0.0|0.0   ;;  %vm1885_vm1 = vmmov 0   ;;  %v1886_v4 = vmov 0.0   ;;  %s2108_s1 = inlined_call_operand.vmem [shape: f32[21,32], index: 1, kind: input, shape index: {}]   ;;  %s2109_s0 = inlined_call_operand.vmem [shape: f32[8,21], index: 0, kind: input, shape index: {}]   ;;  %s2110_s6 = inlined_call_operand.vmem [shape: f32[21,4], index: 6, kind: input, shape index: {}]   ;;  %s2111_s2 = inlined_call_operand.vmem [shape: f32[1,32], index: 2, kind: input, shape index: {}]   ;;  %s2112_s5 = inlined_call_operand.vmem [shape: f32[32,4], index: 5, kind: input, shape index: {}]   ;;  %s2113_s3 = inlined_call_operand.vmem [shape: f32[1,32], index: 3, kind: input, shape index: {}]   ;;  %s2114_s4 = inlined_call_operand.vmem [shape: f32[1,32], index: 4, kind: input, shape index: {}]   ;;  %s2115_s7 = inlined_call_operand.vmem [shape: f32[1,4], index: 7, kind: input, shape index: {}]   ;;  %s2116_s8 = inlined_call_operand.vmem [shape: f32[8,4], index: 8, kind: output, shape index: {}]  }
   0x1   :  { %1796 = vmatprep.subr.bf16.mxu0 %v1884_v0  ;;  %v30_v1 = vld [vmem:[%s2108_s1] sm:$0xff]  ;;  %v31_v2 = vld [vmem:[%s2108_s1 + $0x8] sm:$0xff]  ;;  %v32_v3 = vld [vmem:[%s2108_s1 + $0x10] sm:$0x1f]  ;;  %1628 = vmatprep.mubr.msk.f32.mxu0 %vm1885_vm1, %v1886_v4  ;;  %vm40_vm2 = vcmask 171008   ;;  %vm520_vm3 = vcmask 261120  }
   0x2   :  { %v49_v5 = vand.u32 4294901760, %v30_v1  ;;  %v52_v6 = vand.u32 4294901760, %v31_v2  ;;  %v46_v7 = vsel %vm44_vm0, %v32_v3, 0  ;;  %v29_v8 = vld [vmem:[%s2109_s0] sm:$0xff]  ;;  %1814 = vmatprep.subr.bf16.mxu1 %v1884_v0  ;;  %1682 = vmatprep.mubr.msk.f32.mxu1 %vm1885_vm1, %v1886_v4  ;;  %v561_v33 = vld [vmem:[%s2110_s6 + $0x8] sm:$0xff]  ;;  %vm1534_vm4 = vcmask 31744  }
   0x3   :  { %v55_v9 = vand.u32 4294901760, %v46_v7  ;;  %v42_v10 = vsel %vm40_vm2, %v29_v8, 0  ;;  %v560_v32 = vld [vmem:[%s2110_s6] sm:$0xff]  ;;  %v562_v34 = vld [vmem:[%s2110_s6 + $0x10] sm:$0x1f]  ;;  %v570_v36 = vand.u32 4294901760, %v561_v33 }
   0x4   :  { %v1797_v11 = vpack.c.bf16 %v52_v6, %v49_v5  ;;  %v128_v12 = vsub.f32 %v30_v1, %v49_v5  ;;  %v135_v13 = vsub.f32 %v31_v2, %v52_v6  ;;  %v1951_v14 = vand.u32 4294901760, %v42_v10  ;;  %v1540_v54 = vld [vmem:[%s2111_s2] ss:$0 sm:$0xff]  ;;  %v557_v63 = vld [vmem:[%s2112_s5 + $0x8] sm:$0xff]  ;;  %v558_v6 = vld [vmem:[%s2112_s5 + $0x10] sm:$0xff] }
   0x5   :  { %v142_v15 = vsub.f32 %v46_v7, %v55_v9  ;;  %v567_v35 = vand.u32 4294901760, %v560_v32  ;;  %v564_v37 = vsel %vm44_vm0, %v562_v34, 0  ;;  %v653_v41 = vsub.f32 %v561_v33, %v570_v36  ;;  %v556_v62 = vld [vmem:[%s2112_s5] sm:$0xff]  ;;  %v559_v7 = vld [vmem:[%s2112_s5 + $0x18] sm:$0xff] }
   0x6   :  { %1798 = vmatpush3.bf16.msra.mxu0 %v1797_v11  ;;  %v1954_v16 = vsub.f32 %v42_v10, %v1951_v14  ;;  %v129_v17 = vand.u32 4294901760, %v128_v12  ;;  %v136_v18 = vand.u32 4294901760, %v135_v13  ;;  %v1803_v30 = vpack.c.bf16 %v135_v13, %v128_v12 }
   0x7   :  { %1626 = vmatprep.subr.mxu0 %v1886_v4  ;;  %v143_v19 = vand.u32 4294901760, %v142_v15  ;;  %v573_v38 = vand.u32 4294901760, %v564_v37  ;;  %v1815_v39 = vpack.c.bf16 %v570_v36, %v567_v35  ;;  %v646_v40 = vsub.f32 %v560_v32, %v567_v35 }
   0x8   :  { %v1958_v20 = vand.u32 4294901760, %v1954_v16  ;;  %v130_v21 = vsub.f32 %v128_v12, %v129_v17  ;;  %v137_v22 = vsub.f32 %v135_v13, %v136_v18  ;;  %v1809_v31 = vpack.c.bf16 %v136_v18, %v129_v17 }
   0x9   :  { %v144_v26 = vsub.f32 %v142_v15, %v143_v19  ;;  %v660_v42 = vsub.f32 %v564_v37, %v573_v38  ;;  %1816 = vmatpush3.bf16.msra.mxu1 %v1815_v39  ;;  %v647_v43 = vand.u32 4294901760, %v646_v40  ;;  %v654_v44 = vand.u32 4294901760, %v653_v41 }
   0xa   :  { %1627 = vmatpush3.msra.mxu0 %v55_v9  ;;  %v119_v23 = vsub.f32 %v1954_v16, %v1958_v20  ;;  %v131_v24 = vand.u32 4294901760, %v130_v21  ;;  %v138_v25 = vand.u32 4294901760, %v137_v22  ;;  %1680 = vmatprep.subr.mxu1 %v1886_v4  ;;  %v1821_v53 = vpack.c.bf16 %v653_v41, %v646_v40 }
   0xb   :  { %1799 = vmatprep.subr.bf16.mxu0 %v1884_v0  ;;  %v145_v29 = vand.u32 4294901760, %v144_v26  ;;  %v661_v45 = vand.u32 4294901760, %v660_v42  ;;  %v648_v46 = vsub.f32 %v646_v40, %v647_v43  ;;  %v655_v47 = vsub.f32 %v653_v41, %v654_v44 }
   0xc   :  { %v120_v27 = vand.u32 4294901760, %v119_v23  ;;  %v1800_v28 = vpack.c.bf16 %v138_v25, %v131_v24  ;;  %v1827_v61 = vpack.c.bf16 %v654_v44, %v647_v43  ;;  %v1042_v1 = vand.u32 4294901760, %v556_v62 }
   0xd   :  { %1681 = vmatpush3.msra.mxu1 %v573_v38  ;;  %v649_v48 = vand.u32 4294901760, %v648_v46  ;;  %v656_v49 = vand.u32 4294901760, %v655_v47  ;;  %v662_v50 = vsub.f32 %v660_v42, %v661_v45  ;;  %v1045_v2 = vand.u32 4294901760, %v557_v63 }
   0xe   :  { %1629 = vmatmul.mubr.f32.vlgmr.msra.gmra.mrb[0].mxu0 %v120_v27  ;;  %1817 = vmatprep.subr.bf16.mxu1 %v1884_v0  ;;  %v2045_v3 = vsub.f32 %v556_v62, %v1042_v1  ;;  %v1048_v10 = vand.u32 4294901760, %v558_v6 }
   0xf   :  { %1801 = vmatpush3.bf16.msra.mxu0 %v1800_v28  ;;  %1637 = vmatprep.mubr.msk.f32.mxu0 %vm1885_vm1, %v1886_v4  ;;  %v1818_v51 = vpack.c.bf16 %v656_v49, %v649_v48  ;;  %v663_v52 = vand.u32 4294901760, %v662_v50  ;;  %v2047_v5 = vsub.f32 %v557_v63, %v1045_v2 }
  0x10   :  { %1635 = vmatprep.subr.mxu0 %v1886_v4  ;;  %1683 = vmatmul.mubr.f32.vlgmr.msra.gmra.mrb[0].mxu1 %v120_v27  ;;  %v1123_v8 = vand.u32 4294901760, %v2045_v3 }
  0x11   :  { %1691 = vmatprep.mubr.msk.f32.mxu1 %vm1885_vm1, %v1886_v4  ;;  %1819 = vmatpush3.bf16.msra.mxu1 %v1818_v51  ;;  %v1845_v28 = vpack.c.bf16 %v2047_v5, %v2045_v3 }
  0x12   :  { %1689 = vmatprep.subr.mxu1 %v1886_v4  ;;  %v1124_v12 = vsub.f32 %v2045_v3, %v1123_v8 }
  0x13   :  { %1636 = vmatpush3.msra.mxu0 %v145_v29 }
  0x14   :  { %1802 = vmatprep.subr.bf16.mxu0 %v1884_v0  ;;  %v1125_v17 = vand.u32 4294901760, %v1124_v12 }
  0x15   :  { %1690 = vmatpush3.msra.mxu1 %v663_v52 }
  0x16   :  { %1638 = vmatmul.mubr.f32.vlgmr.msra.gmra.mrb[0].mxu0 %v1951_v14  ;;  %1820 = vmatprep.subr.bf16.mxu1 %v1884_v0 }
  0x17   :  { %1804 = vmatpush3.bf16.msra.mxu0 %v1803_v30  ;;  %1646 = vmatprep.mubr.msk.f32.mxu0 %vm1885_vm1, %v1886_v4 }
  0x18   :  { %1644 = vmatprep.subr.mxu0 %v1886_v4  ;;  %1692 = vmatmul.mubr.f32.vlgmr.msra.gmra.mrb[2].mxu1 %v1951_v14 }
  0x19   :  { %1822 = vmatpush3.bf16.msra.mxu1 %v1821_v53  ;;  %1700 = vmatprep.mubr.msk.f32.mxu1 %vm1885_vm1, %v1886_v4  ;;  %v1541_v53 = vld [vmem:[%s2113_s3] ss:$0 sm:$0xff] }
  0x1a   :  { %1698 = vmatprep.subr.mxu1 %v1886_v4 }
  0x1b   :  { %1645 = vmatpush3.msra.mxu0 %v142_v15 }
  0x1c   :  { %1805 = vmatprep.subr.bf16.mxu0 %v1884_v0 }
  0x1d   :  { %1699 = vmatpush3.msra.mxu1 %v660_v42 }
  0x1e   :  { %1647 = vmatmul.mubr.f32.vlgmr.msra.gmra.mrb[0].mxu0 %v1954_v16  ;;  %1823 = vmatprep.subr.bf16.mxu1 %v1884_v0 }
  0x1f   :  { %1807 = vmatpush3.bf16.msra.mxu0 %v1797_v11  ;;  %1655 = vmatprep.mubr.msk.f32.mxu0 %vm1885_vm1, %v1886_v4 }
  0x20   :  { %1653 = vmatprep.subr.mxu0 %v1886_v4  ;;  %1701 = vmatmul.mubr.f32.vlgmr.msra.gmra.mrb[4].mxu1 %v1954_v16  ;;  %v2063_v16 = vpack.c.bf16 %v1045_v2, %v1042_v1 }
  0x21   :  { %1825 = vmatpush3.bf16.msra.mxu1 %v1815_v39  ;;  %1709 = vmatprep.mubr.msk.f32.mxu1 %vm1885_vm1, %v1886_v4 }
  0x22   :  { %1707 = vmatprep.subr.mxu1 %v1886_v4 }
  0x23   :  { %1654 = vmatpush3.msra.mxu0 %v55_v9 }
  0x24   :  { %1808 = vmatprep.subr.bf16.mxu0 %v1884_v0 }
  0x25   :  { %1708 = vmatpush3.msra.mxu1 %v573_v38 }
  0x26   :  { %1656 = vmatmul.mubr.f32.vlgmr.msra.gmra.mrb[0].mxu0 %v1958_v20  ;;  %1826 = vmatprep.subr.bf16.mxu1 %v1884_v0 }
  0x27   :  { %1810 = vmatpush3.bf16.msra.mxu0 %v1809_v31  ;;  %1664 = vmatprep.mubr.msk.f32.mxu0 %vm1885_vm1, %v1886_v4 }
  0x28   :  { %1662 = vmatprep.subr.mxu0 %v1886_v4  ;;  %1710 = vmatmul.mubr.f32.vlgmr.msra.gmra.mrb[6].mxu1 %v1958_v20 }
  0x29   :  { %1718 = vmatprep.mubr.msk.f32.mxu1 %vm1885_vm1, %v1886_v4  ;;  %1828 = vmatpush3.bf16.msra.mxu1 %v1827_v61 }
  0x2a   :  { %1716 = vmatprep.subr.mxu1 %v1886_v4 }
  0x2b   :  { %1663 = vmatpush3.msra.mxu0 %v143_v19 }
  0x2c   :  { %1811 = vmatprep.subr.bf16.mxu0 %v1884_v0 }
  0x2d   :  { %1717 = vmatpush3.msra.mxu1 %v661_v45 }
  0x2e   :  { %1665 = vmatmul.mubr.f32.vlgmr.msra.gmra.mrb[0].mxu0 %v1951_v14  ;;  %1829 = vmatprep.subr.bf16.mxu1 %v1884_v0 }
  0x2f   :  { %1813 = vmatpush3.bf16.msra.mxu0 %v1797_v11  ;;  %1673 = vmatprep.mubr.msk.f32.mxu0 %vm1885_vm1, %v1886_v4  ;;  %v1051_v11 = vand.u32 4294901760, %v559_v7 }
  0x30   :  { %1671 = vmatprep.subr.mxu0 %v1886_v4  ;;  %1719 = vmatmul.mubr.f32.vlgmr.msra.gmra.mrb[8].mxu1 %v1951_v14 }
  0x31   :  { %1831 = vmatpush3.bf16.msra.mxu1 %v1815_v39  ;;  %1727 = vmatprep.mubr.msk.f32.mxu1 %vm1885_vm1, %v1886_v4  ;;  %v2061_v15 = vsub.f32 %v559_v7, %v1051_v11  ;;  %v1836_v27 = vpack.c.bf16 %v1051_v11, %v1048_v10 }
  0x32   :  { %1725 = vmatprep.subr.mxu1 %v1886_v4 }
  0x33   :  { %1672 = vmatpush3.msra.mxu0 %v55_v9  ;;  %v1130_v9 = vand.u32 4294901760, %v2047_v5  ;;  %v1144_v20 = vand.u32 4294901760, %v2061_v15 }
  0x34   :  { %1832 = vmatprep.subr.bf16.mxu0 %v1884_v0 }
  0x35   :  { %1726 = vmatpush3.msra.mxu1 %v573_v38  ;;  %v1131_v13 = vsub.f32 %v2047_v5, %v1130_v9  ;;  %v1145_v23 = vsub.f32 %v2061_v15, %v1144_v20  ;;  %v1857_v30 = vpack.c.bf16 %v1130_v9, %v1123_v8 }
  0x36   :  { %1674 = vmatmul.mubr.f32.vlgmr.msra.gmra.mrb[0].mxu0 %v1951_v14  ;;  %1728 = vmatmul.mubr.f32.vlgmr.msra.gmra.mrb[10].mxu1 %v1951_v14  ;;  %v2059_v14 = vsub.f32 %v558_v6, %v1048_v10 }
  0x37   :  { %1738 = vmatprep.mubr.msk.f32.mxu0 %vm1885_vm1, %v1886_v4  ;;  %1838 = vmatprep.subr.bf16.mxu1 %v1884_v0  ;;  %v1132_v18 = vand.u32 4294901760, %v1131_v13  ;;  %v1146_v25 = vand.u32 4294901760, %v1145_v23 }
  0x38   :  { %1749 = vmatprep.mubr.msk.f32.mxu1 %vm1885_vm1, %v1886_v4  ;;  %v1137_v19 = vand.u32 4294901760, %v2059_v14  ;;  %1834 = vmatpush3.bf16.msra.mxu0 %v2063_v16  ;;  %v1848_v29 = vpack.c.bf16 %v2061_v15, %v2059_v14 }
  0x39   :  { %v1839_v21 = vpack.c.bf16 %v1132_v18, %v1125_v17  ;;  %1835 = vmatprep.subr.bf16.mxu0 %v1884_v0 }
  0x3a   :  { %v1138_v22 = vsub.f32 %v2059_v14, %v1137_v19  ;;  %v1860_v31 = vpack.c.bf16 %v1144_v20, %v1137_v19 }
  0x3b   :  { %1840 = vmatpush3.bf16.msra.mxu1 %v1839_v21 }
  0x3c   :  { %v1139_v24 = vand.u32 4294901760, %v1138_v22  ;;  %1841 = vmatprep.subr.bf16.mxu1 %v1884_v0  ;;  %1837 = vmatpush3.bf16.msra.mxu0 %v1836_v27 }
  0x3d   :  { %1844 = vmatprep.subr.bf16.mxu0 %v1884_v0 }
  0x3e   :  { %v1842_v26 = vpack.c.bf16 %v1146_v25, %v1139_v24  ;;  %v1543_v25 = vld [vmem:[%s2115_s7] ss:$0 sm:$0xff] }
  0x40   :  { %1843 = vmatpush3.bf16.msra.mxu1 %v1842_v26 }
  0x41   :  { %1850 = vmatprep.subr.bf16.mxu1 %v1884_v0 }
  0xe3   :  { %v640_v32 = vpop.f32.mrb[0].mxu1 }
  0xe4   :  { %v1684_v33 = vpop.f32.mrb[1].mxu1 }
  0xeb   :  { %v726_v34 = vpop.f32.mrb[2].mxu1 }
  0xec   :  { %v727_v35 = vadd.f32 %v726_v34, %v640_v32  ;;  %v1693_v36 = vpop.f32.mrb[3].mxu1 }
  0xf3   :  { %v804_v37 = vpop.f32.mrb[4].mxu1 }
  0xf4   :  { %v805_v38 = vadd.f32 %v804_v37, %v727_v35  ;;  %v1702_v39 = vpop.f32.mrb[5].mxu1 }
  0xfb   :  { %v880_v40 = vpop.f32.mrb[6].mxu1 }
  0xfc   :  { %v881_v41 = vadd.f32 %v880_v40, %v805_v38  ;;  %v1711_v42 = vpop.f32.mrb[7].mxu1 }
 0x103   :  { %v960_v3 = vpop.f32.mrb[8].mxu1 }
 0x104   :  { %v961_v5 = vadd.f32 %v960_v3, %v881_v41  ;;  %v1720_v6 = vpop.f32.mrb[9].mxu1 }
 0x109   :  { %v516_v55 = vpop.f32.mrb[0].mxu0  ;;  %v1034_v7 = vpop.f32.mrb[10].mxu1 }
 0x10a   :  { %v2022_v56 = vadd.f32 %v1540_v54, %v516_v55  ;;  %v1675_v57 = vpop.f32.mrb[1].mxu0  ;;  %v1542_v55 = vld [vmem:[%s2114_s4] ss:$0 sm:$0xff]  ;;  %v1035_v8 = vadd.f32 %v1034_v7, %v961_v5  ;;  %v1729_v9 = vpop.f32.mrb[11].mxu1 }
 0x10c   :  { %v521_v58 = vsel %vm520_vm3, %v2022_v56, 0.0  ;;  %v526_v59 = vmul.f32 %v2022_v56, %v2022_v56 }
 0x10d   :  { %522 = vadd.xlane.f32.xlu0 %v521_v58 }
 0x10e   :  { %v527_v60 = vsel %vm520_vm3, %v526_v59, 0.0 }
 0x111   :  { %528 = vadd.xlane.f32.xlu0 %v527_v60 }
 0x19a   :  { %v523_v43 = vpop.xlane.xlu0 %522 }
 0x19b   :  { %v525_v44 = vmul.f32 0.03125, %v523_v43 }
 0x19d   :  { %v531_v46 = vmul.f32 %v525_v44, %v525_v44  ;;  %v534_v51 = vsub.f32 %v2022_v56, %v525_v44 }
 0x19e   :  { %v529_v45 = vpop.xlane.xlu0 %528 }
 0x19f   :  { %v530_v47 = vmul.f32 0.03125, %v529_v45 }
 0x1a1   :  { %v532_v48 = vsub.f32 %v530_v47, %v531_v46 }
 0x1a3   :  { %v533_v49 = vmax.f32 %v532_v48, 0.0 }
 0x1a5   :  { %v535_v50 = vadd.f32 1e-05, %v533_v49 }
 0x1a7   :  { %1882 = vrsqrt.f32 %v535_v50 }
 0x1b1   :  { %v1883_v52 = vpop.eup %1882 }
 0x1b2   :  { %v537_v54 = vmul.f32 %v1883_v52, %v534_v51 }
 0x1b4   :  { %v545_v57 = vmul.f32 %v1541_v53, %v537_v54 }
 0x1b6   :  { %v553_v58 = vadd.f32 %v1542_v55, %v545_v57 }
 0x1b8   :  { %v554_v59 = vmul.f32 0.1, %v553_v58 }
 0x1ba   :  { %v555_v60 = vmax.f32 %v553_v58, %v554_v59 }
 0x1bc   :  { %v1039_v61 = vsel %vm520_vm3, %v555_v60, 0 }
 0x1bd   :  { %v1110_v62 = vand.u32 4294901760, %v1039_v61 }
 0x1bf   :  { %v1111_v63 = vsub.f32 %v1039_v61, %v1110_v62  ;;  %1750 = vmatmul.mubr.f32.vlgmr.msra.gmra.mrb[12].mxu1 %v1110_v62 }
 0x1c0   :  { %1852 = vmatpush3.bf16.msra.mxu1 %v2063_v16  ;;  %1771 = vmatprep.mubr.msk.f32.mxu1 %vm1885_vm1, %v1886_v4 }
 0x1c1   :  { %1853 = vmatprep.subr.bf16.mxu1 %v1884_v0  ;;  %v1112_v56 = vand.u32 4294901760, %v1111_v63 }
 0x1c3   :  { %v1113_v1 = vsub.f32 %v1111_v63, %v1112_v56 }
 0x1c4   :  { %1855 = vmatpush3.bf16.msra.mxu1 %v1836_v27 }
 0x1c5   :  { %1862 = vmatprep.subr.bf16.mxu1 %v1884_v0  ;;  %v1114_v2 = vand.u32 4294901760, %v1113_v1 }
 0x1c7   :  { %1772 = vmatmul.mubr.f32.vlgmr.msra.gmra.mrb[14].mxu1 %v1112_v56  ;;  %1739 = vmatmul.mubr.f32.vlgmr.msra.gmra.mrb[2].mxu0 %v1114_v2 }
 0x1c8   :  { %1846 = vmatpush3.bf16.msra.mxu0 %v1845_v28  ;;  %1864 = vmatpush3.bf16.msra.mxu1 %v2063_v16 }
 0x1c9   :  { %1847 = vmatprep.subr.bf16.mxu0 %v1884_v0  ;;  %1865 = vmatprep.subr.bf16.mxu1 %v1884_v0 }
 0x1ca   :  { %1760 = vmatprep.mubr.msk.f32.mxu0 %vm1885_vm1, %v1886_v4  ;;  %1793 = vmatprep.mubr.msk.f32.mxu1 %vm1885_vm1, %v1886_v4 }
 0x1cc   :  { %1849 = vmatpush3.bf16.msra.mxu0 %v1848_v29  ;;  %1867 = vmatpush3.bf16.msra.mxu1 %v1836_v27 }
 0x1cd   :  { %1856 = vmatprep.subr.bf16.mxu0 %v1884_v0 }
 0x1cf   :  { %1761 = vmatmul.mubr.f32.vlgmr.msra.gmra.mrb[4].mxu0 %v1111_v63  ;;  %1794 = vmatmul.mubr.f32.vlgmr.msra.gmra.mrb[16].mxu1 %v1110_v62 }
 0x1d0   :  { %1858 = vmatpush3.bf16.msra.mxu0 %v1857_v30  ;;  %1782 = vmatprep.mubr.msk.f32.mxu0 %vm1885_vm1, %v1886_v4 }
 0x1d1   :  { %1859 = vmatprep.subr.bf16.mxu0 %v1884_v0 }
 0x1d4   :  { %1861 = vmatpush3.bf16.msra.mxu0 %v1860_v31 }
 0x1d7   :  { %1783 = vmatmul.mubr.f32.vlgmr.msra.gmra.mrb[6].mxu0 %v1110_v62 }
 0x292   :  { %v1207_v10 = vpop.f32.mrb[12].mxu1 }
 0x293   :  { %v1751_v11 = vpop.f32.mrb[13].mxu1 }
 0x29a   :  { %v1364_v12 = vpop.f32.mrb[14].mxu1  ;;  %v1116_v13 = vpop.f32.mrb[2].mxu0 }
 0x29b   :  { %v1117_v14 = vadd.f32 %v1116_v13, %v1035_v8  ;;  %v1773_v15 = vpop.f32.mrb[15].mxu1  ;;  %v1740_v16 = vpop.f32.mrb[3].mxu0 }
 0x29d   :  { %v1208_v17 = vadd.f32 %v1207_v10, %v1117_v14 }
 0x2a2   :  { %v1287_v18 = vpop.f32.mrb[4].mxu0  ;;  %v1522_v4 = vpop.f32.mrb[16].mxu1 }
 0x2a3   :  { %v1288_v19 = vadd.f32 %v1287_v18, %v1208_v17  ;;  %v1762_v0 = vpop.f32.mrb[5].mxu0  ;;  %v1795_v20 = vpop.f32.mrb[17].mxu1 }
 0x2a5   :  { %v1365_v21 = vadd.f32 %v1364_v12, %v1288_v19 }
 0x2aa   :  { %v1447_v22 = vpop.f32.mrb[6].mxu0 }
 0x2ab   :  { %v1448_v23 = vadd.f32 %v1447_v22, %v1365_v21  ;;  %v1784_v24 = vpop.f32.mrb[7].mxu0 }
 0x2ad   :  { %v1523_v26 = vadd.f32 %v1522_v4, %v1448_v23 }
 0x2af   :  { %v1533_v27 = vadd.f32 %v1543_v25, %v1523_v26 }
 0x2b1   :  { %1535 = vst.msk [vmem:[%s2116_s8] sm:$0xff] %vm1534_vm4, %v1533_v27 }

</bundles_post_ra>
